<compile_context>
chip_gen: v7x
topology: tpu7x:2x2x1
jax: 0.10.0
libtpu: 0.0.40
codegen_flags: <defaults>
</compile_context>

<pallas_src>
import functools

import jax
import jax.numpy as jnp
from jax import lax
from jax.experimental import pallas as pl
from jax.experimental.pallas import tpu as pltpu

# ---- model hyperparameters (small, consistent with the module) -------------
N_EMBD = 32
N_HEAD = 4
HEAD_SIZE = N_EMBD // N_HEAD
SEQ = 8            # T  (<= block_size=48, so the causal mask is just tril(T,T))
BATCH = 2
EPS = 1e-5
NEG_INF = -1e30    # finite additive mask (avoids -inf -> NaN hazards)


def transformer_block_kernel(x_ref,
                             ln1_g_ref, ln1_b_ref,
                             wqkv_ref, wp_ref, bp_ref,
                             ln2_g_ref, ln2_b_ref,
                             w1_ref, b1_ref, w2_ref, b2_ref,
                             o_ref,
                             heads_ref, *, n_head):
    """One grid step processes one sequence: x_ref is (T, C)."""
    x = x_ref[...].astype(jnp.float32)                   # (T, C)
    T, C = x.shape
    D = C // n_head

    # ---------------- LayerNorm 1 (f32 VPU math) ----------------
    mu = jnp.mean(x, axis=-1, keepdims=True)
    var = jnp.mean((x - mu) ** 2, axis=-1, keepdims=True)
    xn = (x - mu) * lax.rsqrt(var + EPS)
    xn = xn * ln1_g_ref[...] + ln1_b_ref[...]            # (T, C)

    # ---- fused QKV projection: bf16 MXU operands, f32 accumulation ----
    qkv = jnp.dot(xn.astype(jnp.bfloat16), wqkv_ref[...],
                  preferred_element_type=jnp.float32)     # (T, 3C)
    scale = C ** (-0.5)          # NOTE: reference scales by n_embd**-0.5
    q = (qkv[:, :C] * scale).astype(jnp.bfloat16)         # fold the scale into Q
    k = qkv[:, C:2 * C].astype(jnp.bfloat16)
    v = qkv[:, 2 * C:].astype(jnp.bfloat16)

    # Per-sequence (T, T) causal additive bias (finite -1e30, NaN-safe).
    row = lax.broadcasted_iota(jnp.int32, (T, T), 0)
    col = lax.broadcasted_iota(jnp.int32, (T, T), 1)
    neg_bias = jnp.where(col <= row, 0.0, NEG_INF)        # (T, T)

    # ---- per-head attention; heads packed at lane offsets into one (T, C)
    # ---- scratch so the output projection is a single deep (K=C) matmul ----
    for h in range(n_head):                               # static unroll (H=4)
        lo = h * D
        q_h = q[:, lo:lo + D]
        k_h = k[:, lo:lo + D]
        v_h = v[:, lo:lo + D]

        # q_h @ k_h^T without materializing the transpose.
        wei = lax.dot_general(q_h, k_h, (((1,), (1,)), ((), ())),
                              preferred_element_type=jnp.float32) + neg_bias
        wei = wei - jnp.max(wei, axis=-1, keepdims=True)  # stable softmax (f32)
        p = jnp.exp(wei)
        p = p * pl.reciprocal(jnp.sum(p, axis=-1, keepdims=True), approx=True)
        # attention dropout: identity in eval mode
        o_h = jnp.dot(p.astype(jnp.bfloat16), v_h,
                      preferred_element_type=jnp.float32)             # (T, D)
        heads_ref[:, lo:lo + D] = o_h

    sa = jnp.dot(heads_ref[...].astype(jnp.bfloat16), wp_ref[...],
                 preferred_element_type=jnp.float32) + bp_ref[...]
    # projection dropout: identity in eval mode

    x1 = x + sa                                           # first residual

    # ---------------- LayerNorm 2 + FeedForward ----------------
    mu2 = jnp.mean(x1, axis=-1, keepdims=True)
    var2 = jnp.mean((x1 - mu2) ** 2, axis=-1, keepdims=True)
    xn2 = (x1 - mu2) * lax.rsqrt(var2 + EPS)
    xn2 = xn2 * ln2_g_ref[...] + ln2_b_ref[...]

    hdn = jnp.dot(xn2.astype(jnp.bfloat16), w1_ref[...],
                  preferred_element_type=jnp.float32) + b1_ref[...]
    hdn = jnp.maximum(hdn, 0.0)                           # ReLU (f32)
    ff = jnp.dot(hdn.astype(jnp.bfloat16), w2_ref[...],
                 preferred_element_type=jnp.float32) + b2_ref[...]
    # ffwd dropout: identity in eval mode

    # NOTE: the (T, 32) store is lane-masked (32/128 lanes); at this size a
    # lane-dense output reinterpretation buys ~nothing, so keep it simple.
    o_ref[...] = (x1 + ff).astype(o_ref.dtype)            # second residual


def prepare_params(params):
    """One-time layout prep (off the hot path): fuse Q/K/V into one lane-dense
    (C, 3C) weight and pre-cast matmul weights to bf16 (MXU-native)."""
    C, H, D = N_EMBD, N_HEAD, HEAD_SIZE

    def fuse(w):                                  # (H, C, D) -> (C, H*D)
        return jnp.transpose(w, (1, 0, 2)).reshape(C, H * D)

    wqkv = jnp.concatenate(
        [fuse(params["wq"]), fuse(params["wk"]), fuse(params["wv"])], axis=-1)

    return {
        "ln1_g": params["ln1_g"], "ln1_b": params["ln1_b"],
        "wqkv": wqkv.astype(jnp.bfloat16),
        "wp": params["wp"].astype(jnp.bfloat16),
        "bp": params["bp"],
        "ln2_g": params["ln2_g"], "ln2_b": params["ln2_b"],
        "w1": params["w1"].astype(jnp.bfloat16), "b1": params["b1"],
        "w2": params["w2"].astype(jnp.bfloat16), "b2": params["b2"],
    }


def transformer_block(x, prep):
    B, T, C = x.shape
    x2d = x.reshape(B * T, C)

    # x / output: tiled one sequence per grid step.
    seq_spec = pl.BlockSpec((T, C), lambda b: (b, 0))

    # Weights/biases: full-array blocks with constant index_maps -> resident
    # in VMEM, never re-staged as the grid advances.
    def resident(arr):
        return pl.BlockSpec(arr.shape, lambda b: (0,) * arr.ndim)

    kernel = functools.partial(transformer_block_kernel, n_head=N_HEAD)

    out = pl.pallas_call(
        kernel,
        out_shape=jax.ShapeDtypeStruct((B * T, C), x.dtype),
        grid=(B,),
        in_specs=[seq_spec,
                  resident(prep["ln1_g"]), resident(prep["ln1_b"]),
                  resident(prep["wqkv"]), resident(prep["wp"]), resident(prep["bp"]),
                  resident(prep["ln2_g"]), resident(prep["ln2_b"]),
                  resident(prep["w1"]), resident(prep["b1"]),
                  resident(prep["w2"]), resident(prep["b2"])],
        out_specs=seq_spec,
        scratch_shapes=[pltpu.VMEM((T, C), jnp.float32)],   # packed head outputs
        input_output_aliases={0: 0},                         # x2d <-> output
        compiler_params=pltpu.CompilerParams(
            dimension_semantics=("parallel",)),               # both TCs on v7x
    )(x2d,
      prep["ln1_g"], prep["ln1_b"],
      prep["wqkv"], prep["wp"], prep["bp"],
      prep["ln2_g"], prep["ln2_b"],
      prep["w1"], prep["b1"], prep["w2"], prep["b2"])

    return out.reshape(B, T, C)


# ---------------- pure-JAX reference for correctness check ----------------
def block_ref(x, p):
    def ln(y, g, b):
        mu = y.mean(-1, keepdims=True)
        var = ((y - mu) ** 2).mean(-1, keepdims=True)
        return (y - mu) / jnp.sqrt(var + EPS) * g + b

    T = x.shape[1]
    with jax.default_matmul_precision("highest"):   # true-f32 baseline
        xn = ln(x, p["ln1_g"], p["ln1_b"])
        mask = jnp.tril(jnp.ones((T, T), dtype=bool))
        outs = []
        for h in range(N_HEAD):
            q = xn @ p["wq"][h]
            k = xn @ p["wk"][h]
            v = xn @ p["wv"][h]
            wei = q @ jnp.swapaxes(k, -1, -2) * (N_EMBD ** -0.5)
            wei = jnp.where(mask, wei, -jnp.inf)
            wei = jax.nn.softmax(wei, axis=-1)
            outs.append(wei @ v)
        sa = jnp.concatenate(outs, axis=-1) @ p["wp"] + p["bp"]
        x = x + sa
        xn2 = ln(x, p["ln2_g"], p["ln2_b"])
        ff = jax.nn.relu(xn2 @ p["w1"] + p["b1"]) @ p["w2"] + p["b2"]
        return x + ff


def init_params(key):
    C, H, D = N_EMBD, N_HEAD, HEAD_SIZE
    ks = jax.random.split(key, 8)
    s = 0.05
    return {
        "ln1_g": jnp.ones((1, C), jnp.float32),
        "ln1_b": jnp.zeros((1, C), jnp.float32),
        "wq": jax.random.normal(ks[0], (H, C, D), jnp.float32) * s,
        "wk": jax.random.normal(ks[1], (H, C, D), jnp.float32) * s,
        "wv": jax.random.normal(ks[2], (H, C, D), jnp.float32) * s,
        "wp": jax.random.normal(ks[3], (C, C), jnp.float32) * s,
        "bp": jax.random.normal(ks[4], (1, C), jnp.float32) * s,
        "ln2_g": jnp.ones((1, C), jnp.float32),
        "ln2_b": jnp.zeros((1, C), jnp.float32),
        "w1": jax.random.normal(ks[5], (C, 4 * C), jnp.float32) * s,
        "b1": jnp.zeros((1, 4 * C), jnp.float32),
        "w2": jax.random.normal(ks[6], (4 * C, C), jnp.float32) * s,
        "b2": jnp.zeros((1, C), jnp.float32),
    }


if __name__ == "__main__":
    key = jax.random.PRNGKey(0)
    pkey, xkey = jax.random.split(key)
    params = init_params(pkey)
    x = jax.random.normal(xkey, (BATCH, SEQ, N_EMBD), jnp.float32)

    prep = prepare_params(params)          # one-time fusion/casts, off hot path
    block_forward = jax.jit(transformer_block)

    out = jax.block_until_ready(block_forward(x, prep))

    ref = block_ref(x, params)
    assert out.shape == (BATCH, SEQ, N_EMBD)
    max_err = jnp.max(jnp.abs(out - ref))
    # bf16 MXU operands + approx softmax reciprocal vs. a highest-precision
    # f32 reference => compare at bf16-appropriate tolerance.
    assert jnp.allclose(out, ref, atol=2e-2, rtol=2e-2), \
        f"mismatch vs JAX reference (max abs err {max_err})"

    print("KERNEL_OK")
</pallas_src>

<mosaic_0001>
module attributes {stable_mosaic.version = 11 : i64} {
  func.func @transformer_block_kernel(%arg0: i32, %arg1: memref<8x32xf32, #tpu.memory_space<vmem>>, %arg2: memref<1x32xf32, #tpu.memory_space<vmem>>, %arg3: memref<1x32xf32, #tpu.memory_space<vmem>>, %arg4: memref<32x96xbf16, #tpu.memory_space<vmem>>, %arg5: memref<32x32xbf16, #tpu.memory_space<vmem>>, %arg6: memref<1x32xf32, #tpu.memory_space<vmem>>, %arg7: memref<1x32xf32, #tpu.memory_space<vmem>>, %arg8: memref<1x32xf32, #tpu.memory_space<vmem>>, %arg9: memref<32x128xbf16, #tpu.memory_space<vmem>>, %arg10: memref<1x128xf32, #tpu.memory_space<vmem>>, %arg11: memref<128x32xbf16, #tpu.memory_space<vmem>>, %arg12: memref<1x32xf32, #tpu.memory_space<vmem>>, %arg13: memref<8x32xf32, #tpu.memory_space<vmem>>, %arg14: memref<8x32xf32, #tpu.memory_space<vmem>>) attributes {dimension_semantics = [#tpu.dimension_semantics<parallel>], iteration_bounds = array<i64: 2>, scalar_prefetch = 0 : i64, scratch_operands = 1 : i64, tpu.core_type = #tpu.core_type<tc>, window_params = [{transform_indices = @transform_0, window_bounds = array<i64: 8, 32>}, {pipeline_mode = #tpu.pipeline_mode<synchronous>, transform_indices = @transform_1, window_bounds = array<i64: 1, 32>}, {pipeline_mode = #tpu.pipeline_mode<synchronous>, transform_indices = @transform_2, window_bounds = array<i64: 1, 32>}, {pipeline_mode = #tpu.pipeline_mode<synchronous>, transform_indices = @transform_3, window_bounds = array<i64: 32, 96>}, {pipeline_mode = #tpu.pipeline_mode<synchronous>, transform_indices = @transform_4, window_bounds = array<i64: 32, 32>}, {pipeline_mode = #tpu.pipeline_mode<synchronous>, transform_indices = @transform_5, window_bounds = array<i64: 1, 32>}, {pipeline_mode = #tpu.pipeline_mode<synchronous>, transform_indices = @transform_6, window_bounds = array<i64: 1, 32>}, {pipeline_mode = #tpu.pipeline_mode<synchronous>, transform_indices = @transform_7, window_bounds = array<i64: 1, 32>}, {pipeline_mode = #tpu.pipeline_mode<synchronous>, transform_indices = @transform_8, window_bounds = array<i64: 32, 128>}, {pipeline_mode = #tpu.pipeline_mode<synchronous>, transform_indices = @transform_9, window_bounds = array<i64: 1, 128>}, {pipeline_mode = #tpu.pipeline_mode<synchronous>, transform_indices = @transform_10, window_bounds = array<i64: 128, 32>}, {pipeline_mode = #tpu.pipeline_mode<synchronous>, transform_indices = @transform_11, window_bounds = array<i64: 1, 32>}, {transform_indices = @transform_12, window_bounds = array<i64: 8, 32>}]} {
    %c0 = arith.constant 0 : index
    %c0_0 = arith.constant 0 : index
    %0 = vector.load %arg1[%c0, %c0_0] : memref<8x32xf32, #tpu.memory_space<vmem>>, vector<8x32xf32>
    %cst = arith.constant dense<0.000000e+00> : vector<8xf32>
    %1 = vector.multi_reduction <add>, %0, %cst [1] : vector<8x32xf32> to vector<8xf32>
    %2 = vector.shape_cast %1 : vector<8xf32> to vector<8x1xf32>
    %cst_1 = arith.constant 3.200000e+01 : f32
    %3 = vector.broadcast %cst_1 : f32 to vector<8x1xf32>
    %4 = arith.divf %2, %3 : vector<8x1xf32>
    %5 = vector.broadcast %4 : vector<8x1xf32> to vector<8x32xf32>
    %6 = arith.subf %0, %5 : vector<8x32xf32>
    %7 = arith.mulf %6, %6 : vector<8x32xf32>
    %cst_2 = arith.constant dense<0.000000e+00> : vector<8xf32>
    %8 = vector.multi_reduction <add>, %7, %cst_2 [1] : vector<8x32xf32> to vector<8xf32>
    %9 = vector.shape_cast %8 : vector<8xf32> to vector<8x1xf32>
    %cst_3 = arith.constant 3.200000e+01 : f32
    %10 = vector.broadcast %cst_3 : f32 to vector<8x1xf32>
    %11 = arith.divf %9, %10 : vector<8x1xf32>
    %12 = vector.broadcast %4 : vector<8x1xf32> to vector<8x32xf32>
    %13 = arith.subf %0, %12 : vector<8x32xf32>
    %cst_4 = arith.constant 9.99999974E-6 : f32
    %14 = vector.broadcast %cst_4 : f32 to vector<8x1xf32>
    %15 = arith.addf %11, %14 : vector<8x1xf32>
    %16 = math.rsqrt %15 : vector<8x1xf32>
    %17 = vector.broadcast %16 : vector<8x1xf32> to vector<8x32xf32>
    %18 = arith.mulf %13, %17 : vector<8x32xf32>
    %c0_5 = arith.constant 0 : index
    %c0_6 = arith.constant 0 : index
    %19 = vector.load %arg2[%c0_5, %c0_6] : memref<1x32xf32, #tpu.memory_space<vmem>>, vector<1x32xf32>
    %20 = vector.broadcast %19 : vector<1x32xf32> to vector<8x32xf32>
    %21 = arith.mulf %18, %20 : vector<8x32xf32>
    %c0_7 = arith.constant 0 : index
    %c0_8 = arith.constant 0 : index
    %22 = vector.load %arg3[%c0_7, %c0_8] : memref<1x32xf32, #tpu.memory_space<vmem>>, vector<1x32xf32>
    %23 = vector.broadcast %22 : vector<1x32xf32> to vector<8x32xf32>
    %24 = arith.addf %21, %23 : vector<8x32xf32>
    %25 = arith.truncf %24 : vector<8x32xf32> to vector<8x32xbf16>
    %c0_9 = arith.constant 0 : index
    %c0_10 = arith.constant 0 : index
    %26 = vector.load %arg4[%c0_9, %c0_10] : memref<32x96xbf16, #tpu.memory_space<vmem>>, vector<32x96xbf16>
    %cst_11 = arith.constant dense<0.000000e+00> : vector<8x96xf32>
    %27 = tpu.matmul %25, %26, %cst_11 {dimension_numbers = #tpu.dot_dimension_numbers<[1], [0], [0], [1], [0, 0, 1, 1], [], []>} : vector<8x32xbf16>, vector<32x96xbf16>, vector<8x96xf32> -> vector<8x96xf32>
    %28 = vector.extract_strided_slice %27 {offsets = [0, 0], sizes = [8, 32], strides = [1, 1]} : vector<8x96xf32> to vector<8x32xf32>
    %cst_12 = arith.constant 0.176776692 : f32
    %29 = vector.broadcast %cst_12 : f32 to vector<8x32xf32>
    %30 = arith.mulf %28, %29 : vector<8x32xf32>
    %31 = arith.truncf %30 : vector<8x32xf32> to vector<8x32xbf16>
    %32 = vector.extract_strided_slice %27 {offsets = [0, 32], sizes = [8, 32], strides = [1, 1]} : vector<8x96xf32> to vector<8x32xf32>
    %33 = arith.truncf %32 : vector<8x32xf32> to vector<8x32xbf16>
    %34 = vector.extract_strided_slice %27 {offsets = [0, 64], sizes = [8, 32], strides = [1, 1]} : vector<8x96xf32> to vector<8x32xf32>
    %35 = arith.truncf %34 : vector<8x32xf32> to vector<8x32xbf16>
    %36 = tpu.iota {dimensions = array<i32: 0>} : vector<8x8xi32>
    %37 = tpu.iota {dimensions = array<i32: 1>} : vector<8x8xi32>
    %38 = arith.cmpi sle, %37, %36 : vector<8x8xi32>
    %cst_13 = arith.constant 0.000000e+00 : f32
    %cst_14 = arith.constant -1.000000e+30 : f32
    %39 = vector.broadcast %cst_13 : f32 to vector<8x8xf32>
    %40 = vector.broadcast %cst_14 : f32 to vector<8x8xf32>
    %41 = arith.select %38, %39, %40 : vector<8x8xi1>, vector<8x8xf32>
    %42 = vector.extract_strided_slice %31 {offsets = [0, 0], sizes = [8, 8], strides = [1, 1]} : vector<8x32xbf16> to vector<8x8xbf16>
    %43 = vector.extract_strided_slice %33 {offsets = [0, 0], sizes = [8, 8], strides = [1, 1]} : vector<8x32xbf16> to vector<8x8xbf16>
    %44 = vector.extract_strided_slice %35 {offsets = [0, 0], sizes = [8, 8], strides = [1, 1]} : vector<8x32xbf16> to vector<8x8xbf16>
    %cst_15 = arith.constant dense<0.000000e+00> : vector<8x8xf32>
    %45 = tpu.matmul %42, %43, %cst_15 {dimension_numbers = #tpu.dot_dimension_numbers<[1], [1], [0], [0], [0, 0, 1, 0], [], []>} : vector<8x8xbf16>, vector<8x8xbf16>, vector<8x8xf32> -> vector<8x8xf32>
    %46 = arith.addf %45, %41 : vector<8x8xf32>
    %cst_16 = arith.constant dense<0xFF800000> : vector<8xf32>
    %47 = vector.multi_reduction <maximumf>, %46, %cst_16 [1] : vector<8x8xf32> to vector<8xf32>
    %48 = vector.shape_cast %47 : vector<8xf32> to vector<8x1xf32>
    %49 = vector.broadcast %48 : vector<8x1xf32> to vector<8x8xf32>
    %50 = arith.subf %46, %49 : vector<8x8xf32>
    %51 = math.exp %50 : vector<8x8xf32>
    %cst_17 = arith.constant dense<0.000000e+00> : vector<8xf32>
    %52 = vector.multi_reduction <add>, %51, %cst_17 [1] : vector<8x8xf32> to vector<8xf32>
    %53 = vector.shape_cast %52 : vector<8xf32> to vector<8x1xf32>
    %54 = tpu.reciprocal %53 {approx = true} : vector<8x1xf32> -> vector<8x1xf32>
    %55 = vector.broadcast %54 : vector<8x1xf32> to vector<8x8xf32>
    %56 = arith.mulf %51, %55 : vector<8x8xf32>
    %57 = arith.truncf %56 : vector<8x8xf32> to vector<8x8xbf16>
    %cst_18 = arith.constant dense<0.000000e+00> : vector<8x8xf32>
    %58 = tpu.matmul %57, %44, %cst_18 {dimension_numbers = #tpu.dot_dimension_numbers<[1], [0], [0], [1], [0, 0, 1, 1], [], []>} : vector<8x8xbf16>, vector<8x8xbf16>, vector<8x8xf32> -> vector<8x8xf32>
    %c0_19 = arith.constant 0 : index
    %c0_20 = arith.constant 0 : index
    %59 = vector.load %arg14[%c0_19, %c0_20] : memref<8x32xf32, #tpu.memory_space<vmem>>, vector<8x8xf32>
    tpu.vector_store %arg14[%c0_19, %c0_20], %58 {strides = array<i32>} : memref<8x32xf32, #tpu.memory_space<vmem>>, vector<8x8xf32>,
    %60 = vector.extract_strided_slice %31 {offsets = [0, 8], sizes = [8, 8], strides = [1, 1]} : vector<8x32xbf16> to vector<8x8xbf16>
    %61 = vector.extract_strided_slice %33 {offsets = [0, 8], sizes = [8, 8], strides = [1, 1]} : vector<8x32xbf16> to vector<8x8xbf16>
    %62 = vector.extract_strided_slice %35 {offsets = [0, 8], sizes = [8, 8], strides = [1, 1]} : vector<8x32xbf16> to vector<8x8xbf16>
    %cst_21 = arith.constant dense<0.000000e+00> : vector<8x8xf32>
    %63 = tpu.matmul %60, %61, %cst_21 {dimension_numbers = #tpu.dot_dimension_numbers<[1], [1], [0], [0], [0, 0, 1, 0], [], []>} : vector<8x8xbf16>, vector<8x8xbf16>, vector<8x8xf32> -> vector<8x8xf32>
    %64 = arith.addf %63, %41 : vector<8x8xf32>
    %cst_22 = arith.constant dense<0xFF800000> : vector<8xf32>
    %65 = vector.multi_reduction <maximumf>, %64, %cst_22 [1] : vector<8x8xf32> to vector<8xf32>
    %66 = vector.shape_cast %65 : vector<8xf32> to vector<8x1xf32>
    %67 = vector.broadcast %66 : vector<8x1xf32> to vector<8x8xf32>
    %68 = arith.subf %64, %67 : vector<8x8xf32>
    %69 = math.exp %68 : vector<8x8xf32>
    %cst_23 = arith.constant dense<0.000000e+00> : vector<8xf32>
    %70 = vector.multi_reduction <add>, %69, %cst_23 [1] : vector<8x8xf32> to vector<8xf32>
    %71 = vector.shape_cast %70 : vector<8xf32> to vector<8x1xf32>
    %72 = tpu.reciprocal %71 {approx = true} : vector<8x1xf32> -> vector<8x1xf32>
    %73 = vector.broadcast %72 : vector<8x1xf32> to vector<8x8xf32>
    %74 = arith.mulf %69, %73 : vector<8x8xf32>
    %75 = arith.truncf %74 : vector<8x8xf32> to vector<8x8xbf16>
    %cst_24 = arith.constant dense<0.000000e+00> : vector<8x8xf32>
    %76 = tpu.matmul %75, %62, %cst_24 {dimension_numbers = #tpu.dot_dimension_numbers<[1], [0], [0], [1], [0, 0, 1, 1], [], []>} : vector<8x8xbf16>, vector<8x8xbf16>, vector<8x8xf32> -> vector<8x8xf32>
    %c0_25 = arith.constant 0 : index
    %c8 = arith.constant 8 : index
    %77 = vector.load %arg14[%c0_25, %c8] : memref<8x32xf32, #tpu.memory_space<vmem>>, vector<8x8xf32>
    tpu.vector_store %arg14[%c0_25, %c8], %76 {strides = array<i32>} : memref<8x32xf32, #tpu.memory_space<vmem>>, vector<8x8xf32>,
    %78 = vector.extract_strided_slice %31 {offsets = [0, 16], sizes = [8, 8], strides = [1, 1]} : vector<8x32xbf16> to vector<8x8xbf16>
    %79 = vector.extract_strided_slice %33 {offsets = [0, 16], sizes = [8, 8], strides = [1, 1]} : vector<8x32xbf16> to vector<8x8xbf16>
    %80 = vector.extract_strided_slice %35 {offsets = [0, 16], sizes = [8, 8], strides = [1, 1]} : vector<8x32xbf16> to vector<8x8xbf16>
    %cst_26 = arith.constant dense<0.000000e+00> : vector<8x8xf32>
    %81 = tpu.matmul %78, %79, %cst_26 {dimension_numbers = #tpu.dot_dimension_numbers<[1], [1], [0], [0], [0, 0, 1, 0], [], []>} : vector<8x8xbf16>, vector<8x8xbf16>, vector<8x8xf32> -> vector<8x8xf32>
    %82 = arith.addf %81, %41 : vector<8x8xf32>
    %cst_27 = arith.constant dense<0xFF800000> : vector<8xf32>
    %83 = vector.multi_reduction <maximumf>, %82, %cst_27 [1] : vector<8x8xf32> to vector<8xf32>
    %84 = vector.shape_cast %83 : vector<8xf32> to vector<8x1xf32>
    %85 = vector.broadcast %84 : vector<8x1xf32> to vector<8x8xf32>
    %86 = arith.subf %82, %85 : vector<8x8xf32>
    %87 = math.exp %86 : vector<8x8xf32>
    %cst_28 = arith.constant dense<0.000000e+00> : vector<8xf32>
    %88 = vector.multi_reduction <add>, %87, %cst_28 [1] : vector<8x8xf32> to vector<8xf32>
    %89 = vector.shape_cast %88 : vector<8xf32> to vector<8x1xf32>
    %90 = tpu.reciprocal %89 {approx = true} : vector<8x1xf32> -> vector<8x1xf32>
    %91 = vector.broadcast %90 : vector<8x1xf32> to vector<8x8xf32>
    %92 = arith.mulf %87, %91 : vector<8x8xf32>
    %93 = arith.truncf %92 : vector<8x8xf32> to vector<8x8xbf16>
    %cst_29 = arith.constant dense<0.000000e+00> : vector<8x8xf32>
    %94 = tpu.matmul %93, %80, %cst_29 {dimension_numbers = #tpu.dot_dimension_numbers<[1], [0], [0], [1], [0, 0, 1, 1], [], []>} : vector<8x8xbf16>, vector<8x8xbf16>, vector<8x8xf32> -> vector<8x8xf32>
    %c0_30 = arith.constant 0 : index
    %c16 = arith.constant 16 : index
    %95 = vector.load %arg14[%c0_30, %c16] : memref<8x32xf32, #tpu.memory_space<vmem>>, vector<8x8xf32>
    tpu.vector_store %arg14[%c0_30, %c16], %94 {strides = array<i32>} : memref<8x32xf32, #tpu.memory_space<vmem>>, vector<8x8xf32>,
    %96 = vector.extract_strided_slice %31 {offsets = [0, 24], sizes = [8, 8], strides = [1, 1]} : vector<8x32xbf16> to vector<8x8xbf16>
    %97 = vector.extract_strided_slice %33 {offsets = [0, 24], sizes = [8, 8], strides = [1, 1]} : vector<8x32xbf16> to vector<8x8xbf16>
    %98 = vector.extract_strided_slice %35 {offsets = [0, 24], sizes = [8, 8], strides = [1, 1]} : vector<8x32xbf16> to vector<8x8xbf16>
    %cst_31 = arith.constant dense<0.000000e+00> : vector<8x8xf32>
    %99 = tpu.matmul %96, %97, %cst_31 {dimension_numbers = #tpu.dot_dimension_numbers<[1], [1], [0], [0], [0, 0, 1, 0], [], []>} : vector<8x8xbf16>, vector<8x8xbf16>, vector<8x8xf32> -> vector<8x8xf32>
    %100 = arith.addf %99, %41 : vector<8x8xf32>
    %cst_32 = arith.constant dense<0xFF800000> : vector<8xf32>
    %101 = vector.multi_reduction <maximumf>, %100, %cst_32 [1] : vector<8x8xf32> to vector<8xf32>
    %102 = vector.shape_cast %101 : vector<8xf32> to vector<8x1xf32>
    %103 = vector.broadcast %102 : vector<8x1xf32> to vector<8x8xf32>
    %104 = arith.subf %100, %103 : vector<8x8xf32>
    %105 = math.exp %104 : vector<8x8xf32>
    %cst_33 = arith.constant dense<0.000000e+00> : vector<8xf32>
    %106 = vector.multi_reduction <add>, %105, %cst_33 [1] : vector<8x8xf32> to vector<8xf32>
    %107 = vector.shape_cast %106 : vector<8xf32> to vector<8x1xf32>
    %108 = tpu.reciprocal %107 {approx = true} : vector<8x1xf32> -> vector<8x1xf32>
    %109 = vector.broadcast %108 : vector<8x1xf32> to vector<8x8xf32>
    %110 = arith.mulf %105, %109 : vector<8x8xf32>
    %111 = arith.truncf %110 : vector<8x8xf32> to vector<8x8xbf16>
    %cst_34 = arith.constant dense<0.000000e+00> : vector<8x8xf32>
    %112 = tpu.matmul %111, %98, %cst_34 {dimension_numbers = #tpu.dot_dimension_numbers<[1], [0], [0], [1], [0, 0, 1, 1], [], []>} : vector<8x8xbf16>, vector<8x8xbf16>, vector<8x8xf32> -> vector<8x8xf32>
    %c0_35 = arith.constant 0 : index
    %c24 = arith.constant 24 : index
    %113 = vector.load %arg14[%c0_35, %c24] : memref<8x32xf32, #tpu.memory_space<vmem>>, vector<8x8xf32>
    tpu.vector_store %arg14[%c0_35, %c24], %112 {strides = array<i32>} : memref<8x32xf32, #tpu.memory_space<vmem>>, vector<8x8xf32>,
    %c0_36 = arith.constant 0 : index
    %c0_37 = arith.constant 0 : index
    %114 = vector.load %arg14[%c0_36, %c0_37] : memref<8x32xf32, #tpu.memory_space<vmem>>, vector<8x32xf32>
    %115 = arith.truncf %114 : vector<8x32xf32> to vector<8x32xbf16>
    %c0_38 = arith.constant 0 : index
    %c0_39 = arith.constant 0 : index
    %116 = vector.load %arg5[%c0_38, %c0_39] : memref<32x32xbf16, #tpu.memory_space<vmem>>, vector<32x32xbf16>
    %cst_40 = arith.constant dense<0.000000e+00> : vector<8x32xf32>
    %117 = tpu.matmul %115, %116, %cst_40 {dimension_numbers = #tpu.dot_dimension_numbers<[1], [0], [0], [1], [0, 0, 1, 1], [], []>} : vector<8x32xbf16>, vector<32x32xbf16>, vector<8x32xf32> -> vector<8x32xf32>
    %c0_41 = arith.constant 0 : index
    %c0_42 = arith.constant 0 : index
    %118 = vector.load %arg6[%c0_41, %c0_42] : memref<1x32xf32, #tpu.memory_space<vmem>>, vector<1x32xf32>
    %119 = vector.broadcast %118 : vector<1x32xf32> to vector<8x32xf32>
    %120 = arith.addf %117, %119 : vector<8x32xf32>
    %121 = arith.addf %0, %120 : vector<8x32xf32>
    %cst_43 = arith.constant dense<0.000000e+00> : vector<8xf32>
    %122 = vector.multi_reduction <add>, %121, %cst_43 [1] : vector<8x32xf32> to vector<8xf32>
    %123 = vector.shape_cast %122 : vector<8xf32> to vector<8x1xf32>
    %cst_44 = arith.constant 3.200000e+01 : f32
    %124 = vector.broadcast %cst_44 : f32 to vector<8x1xf32>
    %125 = arith.divf %123, %124 : vector<8x1xf32>
    %126 = vector.broadcast %125 : vector<8x1xf32> to vector<8x32xf32>
    %127 = arith.subf %121, %126 : vector<8x32xf32>
    %128 = arith.mulf %127, %127 : vector<8x32xf32>
    %cst_45 = arith.constant dense<0.000000e+00> : vector<8xf32>
    %129 = vector.multi_reduction <add>, %128, %cst_45 [1] : vector<8x32xf32> to vector<8xf32>
    %130 = vector.shape_cast %129 : vector<8xf32> to vector<8x1xf32>
    %cst_46 = arith.constant 3.200000e+01 : f32
    %131 = vector.broadcast %cst_46 : f32 to vector<8x1xf32>
    %132 = arith.divf %130, %131 : vector<8x1xf32>
    %133 = vector.broadcast %125 : vector<8x1xf32> to vector<8x32xf32>
    %134 = arith.subf %121, %133 : vector<8x32xf32>
    %cst_47 = arith.constant 9.99999974E-6 : f32
    %135 = vector.broadcast %cst_47 : f32 to vector<8x1xf32>
    %136 = arith.addf %132, %135 : vector<8x1xf32>
    %137 = math.rsqrt %136 : vector<8x1xf32>
    %138 = vector.broadcast %137 : vector<8x1xf32> to vector<8x32xf32>
    %139 = arith.mulf %134, %138 : vector<8x32xf32>
    %c0_48 = arith.constant 0 : index
    %c0_49 = arith.constant 0 : index
    %140 = vector.load %arg7[%c0_48, %c0_49] : memref<1x32xf32, #tpu.memory_space<vmem>>, vector<1x32xf32>
    %141 = vector.broadcast %140 : vector<1x32xf32> to vector<8x32xf32>
    %142 = arith.mulf %139, %141 : vector<8x32xf32>
    %c0_50 = arith.constant 0 : index
    %c0_51 = arith.constant 0 : index
    %143 = vector.load %arg8[%c0_50, %c0_51] : memref<1x32xf32, #tpu.memory_space<vmem>>, vector<1x32xf32>
    %144 = vector.broadcast %143 : vector<1x32xf32> to vector<8x32xf32>
    %145 = arith.addf %142, %144 : vector<8x32xf32>
    %146 = arith.truncf %145 : vector<8x32xf32> to vector<8x32xbf16>
    %c0_52 = arith.constant 0 : index
    %c0_53 = arith.constant 0 : index
    %147 = vector.load %arg9[%c0_52, %c0_53] : memref<32x128xbf16, #tpu.memory_space<vmem>>, vector<32x128xbf16>
    %cst_54 = arith.constant dense<0.000000e+00> : vector<8x128xf32>
    %148 = tpu.matmul %146, %147, %cst_54 {dimension_numbers = #tpu.dot_dimension_numbers<[1], [0], [0], [1], [0, 0, 1, 1], [], []>} : vector<8x32xbf16>, vector<32x128xbf16>, vector<8x128xf32> -> vector<8x128xf32>
    %c0_55 = arith.constant 0 : index
    %c0_56 = arith.constant 0 : index
    %149 = vector.load %arg10[%c0_55, %c0_56] : memref<1x128xf32, #tpu.memory_space<vmem>>, vector<1x128xf32>
    %150 = vector.broadcast %149 : vector<1x128xf32> to vector<8x128xf32>
    %151 = arith.addf %148, %150 : vector<8x128xf32>
    %cst_57 = arith.constant 0.000000e+00 : f32
    %152 = vector.broadcast %cst_57 : f32 to vector<8x128xf32>
    %153 = arith.maximumf %151, %152 : vector<8x128xf32>
    %154 = arith.truncf %153 : vector<8x128xf32> to vector<8x128xbf16>
    %c0_58 = arith.constant 0 : index
    %c0_59 = arith.constant 0 : index
    %155 = vector.load %arg11[%c0_58, %c0_59] : memref<128x32xbf16, #tpu.memory_space<vmem>>, vector<128x32xbf16>
    %cst_60 = arith.constant dense<0.000000e+00> : vector<8x32xf32>
    %156 = tpu.matmul %154, %155, %cst_60 {dimension_numbers = #tpu.dot_dimension_numbers<[1], [0], [0], [1], [0, 0, 1, 1], [], []>} : vector<8x128xbf16>, vector<128x32xbf16>, vector<8x32xf32> -> vector<8x32xf32>
    %c0_61 = arith.constant 0 : index
    %c0_62 = arith.constant 0 : index
    %157 = vector.load %arg12[%c0_61, %c0_62] : memref<1x32xf32, #tpu.memory_space<vmem>>, vector<1x32xf32>
    %158 = vector.broadcast %157 : vector<1x32xf32> to vector<8x32xf32>
    %159 = arith.addf %156, %158 : vector<8x32xf32>
    %160 = arith.addf %121, %159 : vector<8x32xf32>
    %c0_63 = arith.constant 0 : index
    %c0_64 = arith.constant 0 : index
    %161 = vector.load %arg13[%c0_63, %c0_64] : memref<8x32xf32, #tpu.memory_space<vmem>>, vector<8x32xf32>
    tpu.vector_store %arg13[%c0_63, %c0_64], %160 {strides = array<i32>} : memref<8x32xf32, #tpu.memory_space<vmem>>, vector<8x32xf32>,
    return
  }
  func.func @transform_0(%arg0: i32) -> (i32, i32) {
    %c0_i32 = arith.constant 0 : i32
    %c0_i32_0 = arith.constant 0 : i32
    return %arg0, %c0_i32 : i32, i32
  }
  func.func @transform_1(%arg0: i32) -> (i32, i32) {
    %c0_i32 = arith.constant 0 : i32
    %c0_i32_0 = arith.constant 0 : i32
    %c0_i32_1 = arith.constant 0 : i32
    return %c0_i32, %c0_i32_0 : i32, i32
  }
  func.func @transform_2(%arg0: i32) -> (i32, i32) {
    %c0_i32 = arith.constant 0 : i32
    %c0_i32_0 = arith.constant 0 : i32
    %c0_i32_1 = arith.constant 0 : i32
    return %c0_i32, %c0_i32_0 : i32, i32
  }
  func.func @transform_3(%arg0: i32) -> (i32, i32) {
    %c0_i32 = arith.constant 0 : i32
    %c0_i32_0 = arith.constant 0 : i32
    %c0_i32_1 = arith.constant 0 : i32
    return %c0_i32, %c0_i32_0 : i32, i32
  }
  func.func @transform_4(%arg0: i32) -> (i32, i32) {
    %c0_i32 = arith.constant 0 : i32
    %c0_i32_0 = arith.constant 0 : i32
    %c0_i32_1 = arith.constant 0 : i32
    return %c0_i32, %c0_i32_0 : i32, i32
  }
  func.func @transform_5(%arg0: i32) -> (i32, i32) {
    %c0_i32 = arith.constant 0 : i32
    %c0_i32_0 = arith.constant 0 : i32
    %c0_i32_1 = arith.constant 0 : i32
    return %c0_i32, %c0_i32_0 : i32, i32
  }
  func.func @transform_6(%arg0: i32) -> (i32, i32) {
    %c0_i32 = arith.constant 0 : i32
    %c0_i32_0 = arith.constant 0 : i32
    %c0_i32_1 = arith.constant 0 : i32
    return %c0_i32, %c0_i32_0 : i32, i32
  }
  func.func @transform_7(%arg0: i32) -> (i32, i32) {
    %c0_i32 = arith.constant 0 : i32
    %c0_i32_0 = arith.constant 0 : i32
    %c0_i32_1 = arith.constant 0 : i32
    return %c0_i32, %c0_i32_0 : i32, i32
  }
  func.func @transform_8(%arg0: i32) -> (i32, i32) {
    %c0_i32 = arith.constant 0 : i32
    %c0_i32_0 = arith.constant 0 : i32
    %c0_i32_1 = arith.constant 0 : i32
    return %c0_i32, %c0_i32_0 : i32, i32
  }
  func.func @transform_9(%arg0: i32) -> (i32, i32) {
    %c0_i32 = arith.constant 0 : i32
    %c0_i32_0 = arith.constant 0 : i32
    %c0_i32_1 = arith.constant 0 : i32
    return %c0_i32, %c0_i32_0 : i32, i32
  }
  func.func @transform_10(%arg0: i32) -> (i32, i32) {
    %c0_i32 = arith.constant 0 : i32
    %c0_i32_0 = arith.constant 0 : i32
    %c0_i32_1 = arith.constant 0 : i32
    return %c0_i32, %c0_i32_0 : i32, i32
  }
  func.func @transform_11(%arg0: i32) -> (i32, i32) {
    %c0_i32 = arith.constant 0 : i32
    %c0_i32_0 = arith.constant 0 : i32
    %c0_i32_1 = arith.constant 0 : i32
    return %c0_i32, %c0_i32_0 : i32, i32
  }
  func.func @transform_12(%arg0: i32) -> (i32, i32) {
    %c0_i32 = arith.constant 0 : i32
    %c0_i32_0 = arith.constant 0 : i32
    return %arg0, %c0_i32 : i32, i32
  }
}

</mosaic_0001>

<bundles_post_ra>
// kernel: transformer_block.1
= control target key start
LH: loop header
LB: loop body
LE: loop exit
PB: predicated region body
PF: predicated region fallthrough
CT: control target
= control target key end

     0   :  { %s1621_s21 = smov 0   ;;  %s1807_s0 = inlined_call_operand.vmem [shape: f32[16,32], index: 0, kind: input, shape index: {}, may-alias: {0,12}]   ;;  %s1808_s1 = inlined_call_operand.vmem [shape: f32[1,32], index: 1, kind: input, shape index: {}]   ;;  %s1809_s2 = inlined_call_operand.vmem [shape: f32[1,32], index: 2, kind: input, shape index: {}]   ;;  %s1810_s3 = inlined_call_operand.vmem [shape: bf16[32,96], index: 3, kind: input, shape index: {}]   ;;  %s1811_s4 = inlined_call_operand.vmem [shape: bf16[32,32], index: 4, kind: input, shape index: {}]   ;;  %s1812_s5 = inlined_call_operand.vmem [shape: f32[1,32], index: 5, kind: input, shape index: {}]   ;;  %s1813_s6 = inlined_call_operand.vmem [shape: f32[1,32], index: 6, kind: input, shape index: {}]   ;;  %s1814_s7 = inlined_call_operand.vmem [shape: f32[1,32], index: 7, kind: input, shape index: {}]   ;;  %s1815_s8 = inlined_call_operand.vmem [shape: bf16[32,128], index: 8, kind: input, shape index: {}]   ;;  %s1816_s9 = inlined_call_operand.vmem [shape: f32[1,128], index: 9, kind: input, shape index: {}]   ;;  %s1817_s10 = inlined_call_operand.vmem [shape: bf16[128,32], index: 10, kind: input, shape index: {}]   ;;  %s1818_s11 = inlined_call_operand.vmem [shape: f32[1,32], index: 11, kind: input, shape index: {}]   ;;  %s1819_s12 = inlined_call_operand.vmem [shape: f32[16,32], index: 12, kind: output, shape index: {}, may-alias: {0,12}]  }
   0x1 LB: > { %s1305_s22 = sadd.s32 4294967295, %s1537_s21   ;;  %p1309_p0 = scmp.ge.s32.totalorder %s1537_s21, 1  ;;  %s1537_s21 = sphi %s1621_s21, %s22_s21  }
   0x2   : > { %p361_p1 = scmp.lt.s32.totalorder %s1537_s21, 3 }
   0x4   : > { %p362_p2 = pnand %p1309_p0, %p361_p1 }
   0x5   : > { %p401_p3 = scmp.lt.s32.totalorder (!%p362_p2), %s1305_s22, 1  ;;  %vm411_vm0 = vcmask (!%p362_p2), 261120   ;;  %v1497_v7 = vld [vmem:[%s1810_s3] sm:$0xff] (!%p362_p2)   ;;  %v1539_v8 = vmov (!%p362_p2), 0.0   ;;  %vm1540_vm1 = vmmov (!%p362_p2), 0   ;;  %v1498_v9 = vld [vmem:[%s1810_s3 + $0x8] sm:$0xff] (!%p362_p2)   ;;  %v505_v38 = vlaneseq (!%p362_p2) }
   0x6   : > { %365 = sbr.rel (%p362_p2) target bundleno = 2563 (0xa03), region = 68  ;;  %1380 = vmatprep.subr.bf16.mxu0 (!%p362_p2), %v1539_v8  ;;  %1384 = vmatprep.mubr.msk.bf16.mxu0 (!%p362_p2), %vm1540_vm1, %v1539_v8  ;;  %v1312_v14 = vld [vmem:[%s1808_s1] ss:$0 sm:$0xff] (!%p362_p2)  ;;  %s1541_s17 = smov (!%p362_p2), 96   ;;  %vm514_vm2 = vcmask (!%p362_p2), 64512   ;;  %vm578_vm4 = vcmask (!%p362_p2), 1043456  }
   0x7   : > { %1381 = vmatpush3.bf16.msra.mxu0 (!%p362_p2), %v1497_v7  ;;  %1400 = vmatprep.subr.bf16.mxu1 (!%p362_p2), %v1539_v8  ;;  %v1313_v16 = vld [vmem:[%s1809_s2] ss:$0 sm:$0xff] (!%p362_p2)  ;;  %s1542_s18 = smov (!%p362_p2), 120   ;;  %s1543_s19 = smov (!%p362_p2), 88   ;;  %v506_v39 = vshrl.u32 (!%p362_p2), %v505_v38, 7  ;;  %v508_v40 = vand.u32 (!%p362_p2), 127, %v505_v38 }
   0x8   : > { %1382 = vmatprep.subr.bf16.mxu0 (!%p362_p2), %v1539_v8  ;;  %1402 = vmatprep.mubr.msk.bf16.mxu1 (!%p362_p2), %vm1540_vm1, %v1539_v8  ;;  %s1544_s20 = smov (!%p362_p2), 80   ;;  %s1545_s24 = smov (!%p362_p2), 112   ;;  %v1548_v41 = vmov (!%p362_p2), -1e+30   ;;  %vm738_vm5 = vcmask (!%p362_p2), 130112   ;;  %vm854_vm6 = vcmask (!%p362_p2), 195712  }
   0x9   : > { %s1546_s25 = smov (!%p362_p2), 72   ;;  %vm509_vm3 = vcmp.le.s32.totalorder (!%p362_p2), %v508_v40, %v506_v39  ;;  %s1549_s27 = smov (!%p362_p2), 64   ;;  %vm970_vm7 = vcmask (!%p362_p2), 261312  }
   0xa   : > { %v510_v42 = vsel (!%p362_p2), %vm509_vm3, 0.0, %v1548_v41  ;;  %s1550_s28 = smov (!%p362_p2), 56   ;;  %s1551_s29 = smov (!%p362_p2), 48  }
   0xb   : > { %1383 = vmatpush3.bf16.msra.mxu0 (!%p362_p2), %v1498_v9  ;;  %s1552_s30 = smov (!%p362_p2), 40   ;;  %s1553_s13 = smov (!%p362_p2), 8  }
   0xc   : > { %1388 = vmatprep.subr.bf16.mxu0 (!%p362_p2), %v1539_v8 }
   0xd   : > { %s1821_s22 = smov (!%p401_p3, %s1305_s22), 1 }
   0xe   : > { %s1310_s23 = sshll.u32 %s1821_s22, 3 }
   0xf   : > { %s404_s26 = scalar_lea.vmem %s1807_s0, %s1310_s23 }
  0x10   : > { %v1637_v0 = vld [vmem:[%s404_s26] sm:$0xff]  ;;  %s1547_s26 = smov 104  }
  0x11   : > { %v412_v1 = vsel %vm411_vm0, %v1637_v0, 0.0 }
  0x12   : > { %413 = vadd.xlane.f32.xlu0 %v412_v1 }
  0x9f   : > { %v414_v2 = vpop.xlane.xlu0 %413 }
  0xa0   : > { %v416_v3 = vmul.f32 0.03125, %v414_v2 }
  0xa2   : > { %v417_v4 = vsub.f32 %v1637_v0, %v416_v3 }
  0xa4   : > { %v418_v5 = vmul.f32 %v417_v4, %v417_v4 }
  0xa6   : > { %v419_v6 = vsel %vm411_vm0, %v418_v5, 0.0 }
  0xa7   : > { %420 = vadd.xlane.f32.xlu0 %v419_v6 }
 0x134   : > { %v421_v10 = vpop.xlane.xlu0 %420 }
 0x135   : > { %v422_v11 = vmul.f32 0.03125, %v421_v10 }
 0x137   : > { %v423_v12 = vadd.f32 1e-05, %v422_v11 }
 0x139   : > { %1511 = vrsqrt.f32 %v423_v12 }
 0x143   : > { %v1512_v13 = vpop.eup %1511 }
 0x144   : > { %v425_v15 = vmul.f32 %v1512_v13, %v417_v4 }
 0x146   : > { %v433_v17 = vmul.f32 %v1312_v14, %v425_v15 }
 0x148   : > { %v441_v18 = vadd.f32 %v1313_v16, %v433_v17 }
 0x14a   : > { %v442_v19 = vpack.c.bf16 %v441_v18, %v441_v18 }
 0x14c   : > { %1385 = vmatmul.mubr.msk.bf16.vlgmr.msra.gmra.mrb[0].mxu0 %vm411_vm0, %v442_v19 }
 0x14d   : > { %1390 = vmatprep.mubr.msk.bf16.mxu0 %vm1540_vm1, %v1539_v8 }
 0x21f   : > { %v496_v20 = vpop.f32.mrb[0].mxu0 }
 0x220   : > { %v502_v21 = vmul.f32 0.17677669, %v496_v20  ;;  %v1666_v22 = vpack.c.bf16 %v496_v20, %v496_v20  ;;  %v1386_v23 = vpop.f32.mrb[1].mxu0 }
 0x221   : > { %v499_v24 = vpop.f32.mrb[2].mxu0 }
 0x222   : > { %v503_v25 = vpack.c.bf16 %v502_v21, %v502_v21  ;;  %512 = vrot.lane.b32.xlu1 %v1666_v22, %s1541_s17  ;;  %v1387_v26 = vpop.f32.mrb[3].mxu0 }
 0x224   : > { %624 = vrot.lane.b32.xlu0 %v503_v25, %s1542_s18  ;;  %s1554_s18 = smov 16  }
 0x226   : > { %626 = vrot.lane.b32.xlu1 %v1666_v22, %s1543_s19  ;;  %s1555_s19 = smov 24  }
 0x22a   : > { %742 = vrot.lane.b32.xlu1 %v1666_v22, %s1544_s20 }
 0x22e   : > { %740 = vrot.lane.b32.xlu1 %v503_v25, %s1545_s24 }
 0x232   : > { %858 = vrot.lane.b32.xlu1 %v1666_v22, %s1546_s25  ;;  %s408_s25 = scalar_lea.vmem %s1819_s12, %s1310_s23 }
 0x236   : > { %856 = vrot.lane.b32.xlu1 %v503_v25, %s1547_s26 }
 0x294   : > { %v513_v27 = vpop.permute.xlu1 %512 }
 0x295   : > { %v519_v28 = vsel %vm514_vm2, %v513_v27, 0 }
 0x296   : > { %1389 = vmatpush3.bf16.xpose.msra.mxu0 %v519_v28  ;;  %v625_v32 = vpop.permute.xlu0 %624 }
 0x297   : > { %1394 = vmatprep.subr.bf16.mxu0 %v1539_v8 }
 0x298   : > { %v627_v29 = vpop.permute.xlu1 %626 }
 0x299   : > { %v632_v30 = vsel %vm514_vm2, %v627_v29, 0 }
 0x29a   : > { %1401 = vmatpush3.bf16.xpose.msra.mxu1 %v632_v30 }
 0x29b   : > { %1412 = vmatprep.subr.bf16.mxu1 %v1539_v8 }
 0x29c   : > { %v743_v31 = vpop.permute.xlu1 %742 }
 0x29d   : > { %1391 = vmatmul.mubr.msk.bf16.vlgmr.msra.gmra.mrb[4].mxu0 %vm514_vm2, %v503_v25  ;;  %v748_v34 = vsel %vm514_vm2, %v743_v31, 0 }
 0x29e   : > { %1396 = vmatprep.mubr.msk.bf16.mxu0 %vm1540_vm1, %v1539_v8 }
 0x2a0   : > { %v741_v33 = vpop.permute.xlu1 %740 }
 0x2a1   : > { %1403 = vmatmul.mubr.msk.bf16.vlgmr.msra.gmra.mrb[0].mxu1 %vm514_vm2, %v625_v32 }
 0x2a2   : > { %1413 = vmatpush3.bf16.xpose.msra.mxu1 %v748_v34  ;;  %1414 = vmatprep.mubr.msk.bf16.mxu1 %vm1540_vm1, %v1539_v8 }
 0x2a3   : > { %1424 = vmatprep.subr.bf16.mxu1 %v1539_v8 }
 0x2a4   : > { %v859_v35 = vpop.permute.xlu1 %858 }
 0x2a5   : > { %v864_v36 = vsel %vm514_vm2, %v859_v35, 0 }
 0x2a8   : > { %v857_v37 = vpop.permute.xlu1 %856 }
 0x2a9   : > { %1415 = vmatmul.mubr.msk.bf16.vlgmr.msra.gmra.mrb[4].mxu1 %vm514_vm2, %v741_v33 }
 0x2aa   : > { %1425 = vmatpush3.bf16.xpose.msra.mxu1 %v864_v36  ;;  %1426 = vmatprep.mubr.msk.bf16.mxu1 %vm1540_vm1, %v1539_v8 }
 0x2ab   : > { %1436 = vmatprep.subr.bf16.mxu1 %v1539_v8 }
 0x2b1   : > { %1427 = vmatmul.mubr.msk.bf16.vlgmr.msra.gmra.mrb[8].mxu1 %vm514_vm2, %v857_v37 }
 0x2b2   : > { %1440 = vmatprep.mubr.msk.bf16.mxu1 %vm1540_vm1, %v1539_v8 }
 0x370   : > { %v555_v43 = vpop.f32.mrb[4].mxu0 }
 0x371   : > { %v556_v44 = vadd.f32 %v555_v43, %v510_v42  ;;  %v1392_v45 = vpop.f32.mrb[5].mxu0 }
 0x372   : > { %v558_v46 = vpop.f32.mrb[6].mxu0 }
 0x373   : > { %v1393_v47 = vpop.f32.mrb[7].mxu0  ;;  %v561_v48 = vsel %vm514_vm2, %v556_v44, -inf }
 0x374   : > { %v668_v49 = vpop.f32.mrb[0].mxu1  ;;  %562 = vmax.xlane.f32.xlu1 %v561_v48 }
 0x375   : > { %v669_v50 = vadd.f32 %v668_v49, %v510_v42  ;;  %v1404_v51 = vpop.f32.mrb[1].mxu1 }
 0x376   : > { %v671_v52 = vpop.f32.mrb[2].mxu1 }
 0x377   : > { %v1405_v53 = vpop.f32.mrb[3].mxu1  ;;  %v674_v54 = vsel %vm514_vm2, %v669_v50, -inf }
 0x378   : > { %675 = vmax.xlane.f32.xlu0 %v674_v54 }
 0x37c   : > { %v784_v55 = vpop.f32.mrb[4].mxu1 }
 0x37d   : > { %v785_v56 = vadd.f32 %v784_v55, %v510_v42  ;;  %v1416_v57 = vpop.f32.mrb[5].mxu1 }
 0x37e   : > { %v787_v58 = vpop.f32.mrb[6].mxu1  ;;  %v1499_v57 = vld [vmem:[%s1811_s4] sm:$0xff]  }
 0x37f   : > { %v1417_v59 = vpop.f32.mrb[7].mxu1  ;;  %v790_v60 = vsel %vm514_vm2, %v785_v56, -inf  ;;  %1437 = vmatpush3.bf16.msra.mxu1 %v1499_v57  ;;  %v1500_v58 = vld [vmem:[%s1811_s4 + $0x8] sm:$0xff]  }
 0x380   : > { %791 = vmax.xlane.f32.xlu1 %v790_v60  ;;  %1438 = vmatprep.subr.bf16.mxu1 %v1539_v8 }
 0x383   : > { %1439 = vmatpush3.bf16.msra.mxu1 %v1500_v58 }
 0x384   : > { %v900_v61 = vpop.f32.mrb[8].mxu1  ;;  %1452 = vmatprep.subr.bf16.mxu1 %v1539_v8 }
 0x385   : > { %v901_v62 = vadd.f32 %v900_v61, %v510_v42  ;;  %v1428_v63 = vpop.f32.mrb[9].mxu1 }
 0x386   : > { %v903_v1 = vpop.f32.mrb[10].mxu1 }
 0x387   : > { %v1429_v2 = vpop.f32.mrb[11].mxu1  ;;  %v906_v3 = vsel %vm514_vm2, %v901_v62, -inf }
 0x388   : > { %907 = vmax.xlane.f32.xlu0 %v906_v3 }
 0x401   : > { %v563_v4 = vpop.xlane.xlu1 %562 }
 0x402   : > { %v564_v5 = vsub.f32 %v556_v44, %v563_v4 }
 0x404   : > { %v565_v6 = vmul.f32 1.442695, %v564_v5 }
 0x405   : > { %v676_v7 = vpop.xlane.xlu0 %675 }
 0x406   : > { %1513 = vpow2.f32 %v565_v6  ;;  %v677_v9 = vsub.f32 %v669_v50, %v676_v7 }
 0x408   : > { %v678_v10 = vmul.f32 1.442695, %v677_v9 }
 0x40a   : > { %1515 = vpow2.f32 %v678_v10  ;;  %v1325_v10 = vld [vmem:[%s1812_s5] ss:$0 sm:$0xff] }
 0x40d   : > { %v792_v20 = vpop.xlane.xlu1 %791 }
 0x40e   : > { %v793_v21 = vsub.f32 %v785_v56, %v792_v20 }
 0x410   : > { %v1514_v11 = vpop.eup %1513  ;;  %v794_v23 = vmul.f32 1.442695, %v793_v21 }
 0x411   : > { %v567_v12 = vsel %vm514_vm2, %v1514_v11, 0.0 }
 0x412   : > { %568 = vadd.xlane.f32.xlu1 %v567_v12 }
 0x414   : > { %v1516_v13 = vpop.eup %1515 }
 0x415   : > { %v908_v14 = vpop.xlane.xlu0 %907  ;;  %v680_v15 = vsel %vm514_vm2, %v1516_v13, 0.0 }
 0x416   : > { %v909_v16 = vsub.f32 %v901_v62, %v908_v14  ;;  %681 = vadd.xlane.f32.xlu0 %v680_v15 }
 0x418   : > { %v910_v17 = vmul.f32 1.442695, %v909_v16 }
 0x41a   : > { %1517 = vpow2.f32 %v910_v17 }
 0x41b   : > { %1519 = vpow2.f32 %v794_v23 }
 0x423   : > { %573 = vrot.lane.b32.xlu1 %v1666_v22, %s1549_s27 }
 0x424   : > { %v1518_v18 = vpop.eup %1517 }
 0x425   : > { %v912_v19 = vsel %vm514_vm2, %v1518_v18, 0.0  ;;  %v1520_v24 = vpop.eup %1519 }
 0x426   : > { %913 = vadd.xlane.f32.xlu0 %v912_v19  ;;  %v796_v25 = vsel %vm514_vm2, %v1520_v24, 0.0 }
 0x43c   : > { %686 = vrot.lane.b32.xlu0 %v1666_v22, %s1550_s28 }
 0x447   : > { %797 = vadd.xlane.f32.xlu1 %v796_v25  ;;  %v1503_v25 = vld [vmem:[%s1817_s10] sm:$0xff]  }
 0x458   : > { %802 = vrot.lane.b32.xlu1 %v1666_v22, %s1551_s29 }
 0x45c   : > { %918 = vrot.lane.b32.xlu1 %v1666_v22, %s1552_s30 }
 0x49f   : > { %v569_v26 = vpop.xlane.xlu1 %568 }
 0x4a0   : > { %1521 = vrcp.f32 %v569_v26  ;;  %v1504_v26 = vld [vmem:[%s1817_s10 + $0x8] sm:$0xff]  }
 0x4a3   : > { %v574_v27 = vpop.permute.xlu1 %573  ;;  %v682_v29 = vpop.xlane.xlu0 %681 }
 0x4a4   : > { %v580_v28 = vsel %vm578_vm4, %v574_v27, 0  ;;  %1523 = vrcp.f32 %v682_v29  ;;  %v1505_v27 = vld [vmem:[%s1817_s10 + $0x10] sm:$0xff]   ;;  %v1507_v29 = vld [vmem:[%s1817_s10 + $0x20] sm:$0xff]  }
 0x4a5   : > { %1395 = vmatpush3.bf16.msra.mxu0 %v580_v28  ;;  %v1506_v28 = vld [vmem:[%s1817_s10 + $0x18] sm:$0xff]  }
 0x4a6   : > { %1406 = vmatprep.subr.bf16.mxu0 %v1539_v8 }
 0x4aa   : > { %v1522_v30 = vpop.eup %1521 }
 0x4ab   : > { %v571_v31 = vmul.f32 %v1522_v30, %v1514_v11  ;;  %v1508_v30 = vld [vmem:[%s1817_s10 + $0x28] sm:$0xff]  }
 0x4ad   : > { %v572_v32 = vpack.c.bf16 %v571_v31, %v571_v31 }
 0x4ae   : > { %v1524_v22 = vpop.eup %1523 }
 0x4af   : > { %1397 = vmatmul.mubr.msk.bf16.vlgmr.msra.gmra.mrb[8].mxu0 %vm514_vm2, %v572_v32  ;;  %v684_v34 = vmul.f32 %v1524_v22, %v1516_v13 }
 0x4b0   : > { %1408 = vmatprep.mubr.msk.bf16.mxu0 %vm1540_vm1, %v1539_v8 }
 0x4b1   : > { %v685_v37 = vpack.c.bf16 %v684_v34, %v684_v34  ;;  %v1329_v34 = vld [vmem:[%s1813_s6] ss:$0 sm:$0xff] }
 0x4b3   : > { %v914_v33 = vpop.xlane.xlu0 %913 }
 0x4b7   : > { %v687_v35 = vpop.permute.xlu0 %686 }
 0x4b8   : > { %v692_v36 = vsel %vm578_vm4, %v687_v35, 0 }
 0x4b9   : > { %1407 = vmatpush3.bf16.msra.mxu0 %v692_v36  ;;  %v1330_v36 = vld [vmem:[%s1814_s7] ss:$0 sm:$0xff] }
 0x4ba   : > { %1418 = vmatprep.subr.bf16.mxu0 %v1539_v8 }
 0x4bc   : > { %1409 = vmatmul.mubr.msk.bf16.vlgmr.msra.gmra.mrb[12].mxu0 %vm514_vm2, %v685_v37 }
 0x4bd   : > { %1420 = vmatprep.mubr.msk.bf16.mxu0 %vm1540_vm1, %v1539_v8 }
 0x4d4   : > { %v798_v38 = vpop.xlane.xlu1 %797 }
 0x4d5   : > { %1525 = vrcp.f32 %v798_v38 }
 0x4d6   : > { %1527 = vrcp.f32 %v914_v33 }
 0x4d8   : > { %v803_v39 = vpop.permute.xlu1 %802 }
 0x4d9   : > { %v808_v40 = vsel %vm578_vm4, %v803_v39, 0 }
 0x4da   : > { %1419 = vmatpush3.bf16.msra.mxu0 %v808_v40  ;;  %v1509_v40 = vld [vmem:[%s1817_s10 + $0x30] sm:$0xff]  }
 0x4db   : > { %1430 = vmatprep.subr.bf16.mxu0 %v1539_v8 }
 0x4dc   : > { %v919_v43 = vpop.permute.xlu1 %918 }
 0x4dd   : > { %v924_v46 = vsel %vm578_vm4, %v919_v43, 0 }
 0x4df   : > { %v1526_v41 = vpop.eup %1525 }
 0x4e0   : > { %v800_v42 = vmul.f32 %v1526_v41, %v1520_v24  ;;  %v1528_v45 = vpop.eup %1527  ;;  %v1501_v24 = vld [vmem:[%s1815_s8] sm:$0xff]   ;;  %v1510_v41 = vld [vmem:[%s1817_s10 + $0x38] sm:$0xff]  }
 0x4e1   : > { %v916_v47 = vmul.f32 %v1528_v45, %v1518_v18 }
 0x4e2   : > { %v801_v44 = vpack.c.bf16 %v800_v42, %v800_v42  ;;  %v1331_v42 = vld [vmem:[%s1816_s9] ss:$0 sm:$0xff] }
 0x4e3   : > { %v917_v48 = vpack.c.bf16 %v916_v47, %v916_v47 }
 0x4e4   : > { %1421 = vmatmul.mubr.msk.bf16.vlgmr.msra.gmra.mrb[16].mxu0 %vm514_vm2, %v801_v44 }
 0x4e5   : > { %1431 = vmatpush3.bf16.msra.mxu0 %v924_v46  ;;  %1432 = vmatprep.mubr.msk.bf16.mxu0 %vm1540_vm1, %v1539_v8 }
 0x4e6   : > { %1444 = vmatprep.subr.bf16.mxu0 %v1539_v8 }
 0x4ec   : > { %1433 = vmatmul.mubr.msk.bf16.vlgmr.msra.gmra.mrb[20].mxu0 %vm514_vm2, %v917_v48 }
 0x4ed   : > { %1448 = vmatprep.mubr.msk.bf16.mxu0 %vm1540_vm1, %v1539_v8  ;;  %1445 = vmatpush3.bf16.msra.mxu0 %v1501_v24 }
 0x4ee   : > { %1446 = vmatprep.subr.bf16.mxu0 %v1539_v8 }
 0x582   : > { %v616_v49 = vpop.f32.mrb[8].mxu0 }
 0x583   : > { %622 = vst.msk [vmem:[#allocation2] sm:$0xff] %vm514_vm2, %v616_v49  ;;  %v1398_v50 = vpop.f32.mrb[9].mxu0 }
 0x584   : > { %v619_v51 = vpop.f32.mrb[10].mxu0 }
 0x585   : > { %v1399_v52 = vpop.f32.mrb[11].mxu0 }
 0x58f   : > { %v728_v53 = vpop.f32.mrb[12].mxu0 }
 0x590   : > { %735 = vrot.lane.b32.xlu0 %v728_v53, %s1553_s13  ;;  %v1410_v54 = vpop.f32.mrb[13].mxu0 }
 0x591   : > { %v731_v55 = vpop.f32.mrb[14].mxu0 }
 0x592   : > { %v1411_v56 = vpop.f32.mrb[15].mxu0 }
 0x5b7   : > { %v844_v59 = vpop.f32.mrb[16].mxu0 }
 0x5b8   : > { %851 = vrot.lane.b32.xlu1 %v844_v59, %s1554_s18  ;;  %v1422_v60 = vpop.f32.mrb[17].mxu0 }
 0x5b9   : > { %v847_v61 = vpop.f32.mrb[18].mxu0 }
 0x5ba   : > { %v1423_v62 = vpop.f32.mrb[19].mxu0 }
 0x5bf   : > { %v960_v63 = vpop.f32.mrb[20].mxu0 }
 0x5c0   : > { %967 = vrot.lane.b32.xlu0 %v960_v63, %s1555_s19  ;;  %v1434_v1 = vpop.f32.mrb[21].mxu0 }
 0x5c1   : > { %v963_v2 = vpop.f32.mrb[22].mxu0 }
 0x5c2   : > { %v1435_v3 = vpop.f32.mrb[23].mxu0 }
 0x602   : > { %v736_v4 = vpop.permute.xlu0 %735 }
 0x603   : > { %739 = vst.msk [vmem:[#allocation2] sm:$0xff] %vm738_vm5, %v736_v4 }
 0x62a   : > { %v852_v5 = vpop.permute.xlu1 %851 }
 0x62b   : > { %855 = vst.msk [vmem:[#allocation2] sm:$0xff] %vm854_vm6, %v852_v5 }
 0x632   : > { %v968_v6 = vpop.permute.xlu0 %967 }
 0x633   : > { %971 = vst.msk [vmem:[#allocation2] sm:$0xff] %vm970_vm7, %v968_v6 }
 0x63a   : > { %v972_v7 = vld [vmem:[#allocation2] sm:$0xff] }
 0x63b   : > { %v973_v9 = vpack.c.bf16 %v972_v7, %v972_v7 }
 0x63d   : > { %1441 = vmatmul.mubr.msk.bf16.vlgmr.msra.gmra.mrb[12].mxu1 %vm411_vm0, %v973_v9 }
 0x63e   : > { %1468 = vmatprep.mubr.msk.bf16.mxu1 %vm1540_vm1, %v1539_v8  ;;  %1453 = vmatpush3.bf16.msra.mxu1 %v1503_v25 }
 0x63f   : > { %1454 = vmatprep.subr.bf16.mxu1 %v1539_v8 }
 0x642   : > { %1455 = vmatpush3.bf16.msra.mxu1 %v1504_v26 }
 0x643   : > { %1456 = vmatprep.subr.bf16.mxu1 %v1539_v8 }
 0x646   : > { %1457 = vmatpush3.bf16.msra.mxu1 %v1505_v27 }
 0x647   : > { %1458 = vmatprep.subr.bf16.mxu1 %v1539_v8 }
 0x64a   : > { %1459 = vmatpush3.bf16.msra.mxu1 %v1506_v28 }
 0x64b   : > { %1460 = vmatprep.subr.bf16.mxu1 %v1539_v8 }
 0x64e   : > { %1461 = vmatpush3.bf16.msra.mxu1 %v1507_v29 }
 0x64f   : > { %1462 = vmatprep.subr.bf16.mxu1 %v1539_v8 }
 0x652   : > { %1463 = vmatpush3.bf16.msra.mxu1 %v1508_v30 }
 0x653   : > { %1464 = vmatprep.subr.bf16.mxu1 %v1539_v8 }
 0x656   : > { %1465 = vmatpush3.bf16.msra.mxu1 %v1509_v40 }
 0x657   : > { %1466 = vmatprep.subr.bf16.mxu1 %v1539_v8  ;;  %v1335_v8 = vld [vmem:[%s1818_s11] ss:$0 sm:$0xff] }
 0x65a   : > { %1467 = vmatpush3.bf16.msra.mxu1 %v1510_v41 }
 0x710   : > { %v1034_v11 = vpop.f32.mrb[12].mxu1 }
 0x711   : > { %v1035_v12 = vadd.f32 %v1325_v10, %v1034_v11  ;;  %v1442_v13 = vpop.f32.mrb[13].mxu1 }
 0x712   : > { %v1037_v14 = vpop.f32.mrb[14].mxu1 }
 0x713   : > { %v1740_v15 = vadd.f32 %v1035_v12, %v1637_v0  ;;  %v1443_v16 = vpop.f32.mrb[15].mxu1  ;;  %v1502_v0 = vld [vmem:[%s1815_s8 + $0x8] sm:$0xff]  }
 0x714   : > { %1447 = vmatpush3.bf16.msra.mxu0 %v1502_v0 }
 0x715   : > { %v1041_v17 = vsel %vm411_vm0, %v1740_v15, 0.0 }
 0x716   : > { %1042 = vadd.xlane.f32.xlu1 %v1041_v17 }
 0x7a3   : > { %v1043_v18 = vpop.xlane.xlu1 %1042 }
 0x7a4   : > { %v1044_v19 = vmul.f32 0.03125, %v1043_v18 }
 0x7a6   : > { %v1045_v20 = vsub.f32 %v1740_v15, %v1044_v19 }
 0x7a8   : > { %v1046_v21 = vmul.f32 %v1045_v20, %v1045_v20 }
 0x7aa   : > { %v1047_v23 = vsel %vm411_vm0, %v1046_v21, 0.0 }
 0x7ab   : > { %1048 = vadd.xlane.f32.xlu0 %v1047_v23 }
 0x838   : > { %v1049_v31 = vpop.xlane.xlu0 %1048 }
 0x839   : > { %v1050_v32 = vmul.f32 0.03125, %v1049_v31 }
 0x83b   : > { %v1051_v22 = vadd.f32 1e-05, %v1050_v32 }
 0x83d   : > { %1529 = vrsqrt.f32 %v1051_v22 }
 0x847   : > { %v1530_v33 = vpop.eup %1529 }
 0x848   : > { %v1053_v35 = vmul.f32 %v1530_v33, %v1045_v20 }
 0x84a   : > { %v1061_v37 = vmul.f32 %v1329_v34, %v1053_v35 }
 0x84c   : > { %v1069_v38 = vadd.f32 %v1330_v36, %v1061_v37 }
 0x84e   : > { %v1070_v39 = vpack.c.bf16 %v1069_v38, %v1069_v38 }
 0x850   : > { %1449 = vmatmul.mubr.msk.bf16.vlgmr.msra.gmra.mrb[24].mxu0 %vm411_vm0, %v1070_v39 }
 0x923   : > { %v1131_v43 = vpop.f32.mrb[24].mxu0 }
 0x924   : > { %v1132_v44 = vadd.f32 %v1331_v42, %v1131_v43  ;;  %v1450_v45 = vpop.f32.mrb[25].mxu0 }
 0x925   : > { %v1134_v46 = vpop.f32.mrb[26].mxu0 }
 0x926   : > { %v1137_v47 = vmax.f32 %v1132_v44, 0.0  ;;  %v1451_v48 = vpop.f32.mrb[27].mxu0 }
 0x928   : > { %v1138_v49 = vpack.c.bf16 %v1137_v47, %v1137_v47 }
 0x92a   : > { %1469 = vmatmul.mubr.bf16.vlgmr.msra.gmra.mrb[16].mxu1 %v1138_v49 }
 0x9fd   : > { %v1244_v50 = vpop.f32.mrb[16].mxu1 }
 0x9fe   : > { %v1245_v51 = vadd.f32 %v1335_v8, %v1244_v50  ;;  %v1470_v52 = vpop.f32.mrb[17].mxu1 }
 0x9ff   : > { %v1247_v53 = vpop.f32.mrb[18].mxu1 }
 0xa00   : > { %v1250_v54 = vadd.f32 %v1245_v51, %v1740_v15  ;;  %v1471_v55 = vpop.f32.mrb[19].mxu1 }
 0xa02   : > { %1251 = vst.msk [vmem:[%s408_s25] sm:$0xff] %vm411_vm0, %v1250_v54 }
 0xa03 PF: > { %s22_s21 = sadd.s32 1, %s1537_s21  }
 0xa04   : > { %p19_p4 = scmp.ge.s32.totalorder %s22_s21, 4  }
 0xa06   :  { %21 = sbr.rel (!%p19_p4) target bundleno = 1 (0x1), region = 98 }

</bundles_post_ra>
